<compile_context>
chip_gen: v5e
topology: v5e:2x2
jax: 0.10.0
libtpu: 0.0.40
codegen_flags: <defaults>
</compile_context>

<pallas_src>
import functools

import jax
import jax.numpy as jnp
from jax.experimental import pallas as pl
from jax.experimental.pallas import tpu as pltpu

_LANE = 128
_SUBLANE = 8
_TILE_ELEMS = _SUBLANE * _LANE  # 1024


def _cdiv(a, b):
    return -(-a // b)


def _new_loss_kernel(x_ref, y_ref, o_ref, acc_ref, *,
                     lamda, rows, block_rows, blocks_per_split, need_mask):
    """Grid = (split, block-within-split). acc_ref is an (8,128) f32 running
    partial-sum; o_ref is the (1,8,128) per-split partial-sum output."""
    s = pl.program_id(0)
    j = pl.program_id(1)

    @pl.when(j == 0)
    def _():
        acc_ref[...] = jnp.zeros_like(acc_ref)

    d = jnp.abs(x_ref[...].astype(jnp.float32) - y_ref[...].astype(jnp.float32))

    if need_mask:
        # Mask rows past the true row count (ragged last block / phantom
        # blocks of the split). OOB reads hold unspecified data; jnp.where
        # selection drops it (no NaN propagation).
        base = (s * blocks_per_split + j) * block_rows
        row_idx = base + jax.lax.broadcasted_iota(jnp.int32, (block_rows, _LANE), 0)
        d = jnp.where(row_idx < rows, d, 0.0)

    if lamda == 2:
        p = d * d                      # fast path: pure VPU; 1000**2 folded into scale
    else:
        p = jnp.power(d, jnp.float32(lamda))   # 1000**lamda folded into scale

    # Pure-VPU partial reduction: (block_rows,128) -> (block_rows/8, 8, 128),
    # sum over the leading (non-lane, non-sublane) axis into the accumulator.
    acc_ref[...] += jnp.sum(p.reshape(block_rows // _SUBLANE, _SUBLANE, _LANE), axis=0)

    @pl.when(j == pl.num_programs(1) - 1)
    def _():
        o_ref[...] = acc_ref[...].reshape(1, _SUBLANE, _LANE)


def new_loss(x, y, lamda=2, *, block_rows=2048, num_splits=2):
    """Pallas TPU implementation of newLoss.forward."""
    assert x.shape == y.shape, "x and y must have the same shape"
    # TODO(synk): lamda <= 0 is unsupported (padded / masked zeros would need
    # to contribute 0**lamda != 0); the module default is lamda = 2.
    assert lamda > 0, "lamda must be > 0"

    n_true = x.size
    xf = jnp.ravel(x)   # keep native dtype; upcast inside the kernel
    yf = jnp.ravel(y)

    # Pad only to (8,128)-element granularity, and only if actually needed.
    n_pad = _cdiv(n_true, _TILE_ELEMS) * _TILE_ELEMS
    if n_pad != n_true:
        pad = n_pad - n_true
        xf = jnp.concatenate([xf, jnp.zeros((pad,), xf.dtype)])
        yf = jnp.concatenate([yf, jnp.zeros((pad,), yf.dtype)])

    rows = n_pad // _LANE            # multiple of 8
    x2 = xf.reshape(rows, _LANE)
    y2 = yf.reshape(rows, _LANE)

    block_rows = min(block_rows, rows)              # rows is a multiple of 8
    total_blocks = _cdiv(rows, block_rows)
    num_splits = max(1, min(num_splits, total_blocks))
    blocks_per_split = _cdiv(total_blocks, num_splits)
    # Mask needed if the (split x block) tiling over-covers the real rows.
    need_mask = (num_splits * blocks_per_split * block_rows) != rows

    def in_map(s, j):
        # Clamp phantom blocks (when total_blocks doesn't divide evenly) onto
        # the last real block; their contribution is fully masked in-kernel.
        return (jnp.minimum(s * blocks_per_split + j, total_blocks - 1), 0)

    kernel = functools.partial(
        _new_loss_kernel,
        lamda=lamda, rows=rows, block_rows=block_rows,
        blocks_per_split=blocks_per_split, need_mask=need_mask)

    bytes_in = (x2.dtype.itemsize + y2.dtype.itemsize) * n_pad

    partials = pl.pallas_call(
        kernel,
        out_shape=jax.ShapeDtypeStruct((num_splits, _SUBLANE, _LANE), jnp.float32),
        grid_spec=pltpu.PrefetchScalarGridSpec(
            num_scalar_prefetch=0,
            grid=(num_splits, blocks_per_split),
            in_specs=[
                pl.BlockSpec((block_rows, _LANE), in_map),
                pl.BlockSpec((block_rows, _LANE), in_map),
            ],
            out_specs=pl.BlockSpec((1, _SUBLANE, _LANE), lambda s, j: (s, 0, 0)),
            scratch_shapes=[pltpu.VMEM((_SUBLANE, _LANE), jnp.float32)],
        ),
        compiler_params=pltpu.CompilerParams(
            # leading axis parallel -> both TCs on v7x; inner axis carries the
            # running-sum accumulator.
            dimension_semantics=("parallel", "arbitrary"),
        ),
        cost_estimate=pl.CostEstimate(
            flops=5 * n_pad,
            transcendentals=0,
            bytes_accessed=bytes_in + 4 * num_splits * _TILE_ELEMS),
    )(x2, y2)

    # Late scaling: fold 1000**lamda and 1/N in once, after the big reduction.
    scale = (1000.0 ** lamda) / float(n_true)
    return jnp.sum(partials) * jnp.float32(scale)


if __name__ == "__main__":
    key = jax.random.PRNGKey(0)
    kx, ky = jax.random.split(key)

    # Small NCHW shapes consistent with an image-regression loss.
    x = jax.random.normal(kx, (2, 4, 16, 16), dtype=jnp.float32)
    y = jax.random.normal(ky, (2, 4, 16, 16), dtype=jnp.float32)

    loss = jax.block_until_ready(new_loss(x, y, lamda=2))
    ref = jnp.mean((jnp.abs(x - y) * 1000.0) ** 2)
    assert jnp.allclose(loss, ref, rtol=1e-4), (loss, ref)

    # Larger, non-1024-aligned shape: exercises the 2-way split and the
    # ragged-last-block mask path.
    kx2, ky2 = jax.random.split(ky)
    xb = jax.random.normal(kx2, (2, 4, 200, 200), dtype=jnp.float32)
    yb = jax.random.normal(ky2, (2, 4, 200, 200), dtype=jnp.float32)
    loss_b = jax.block_until_ready(new_loss(xb, yb, lamda=2))
    ref_b = jnp.mean((jnp.abs(xb - yb) * 1000.0) ** 2)
    assert jnp.allclose(loss_b, ref_b, rtol=5e-4), (loss_b, ref_b)

    print("KERNEL_OK")
</pallas_src>

<mosaic_0001>
module attributes {stable_mosaic.version = 11 : i64} {
  func.func @_new_loss_kernel(%arg0: i32, %arg1: i32, %arg2: memref<16x128xf32, #tpu.memory_space<vmem>>, %arg3: memref<16x128xf32, #tpu.memory_space<vmem>>, %arg4: memref<1x8x128xf32, #tpu.memory_space<vmem>>, %arg5: memref<8x128xf32, #tpu.memory_space<vmem>>) attributes {dimension_semantics = [#tpu.dimension_semantics<parallel>, #tpu.dimension_semantics<arbitrary>], iteration_bounds = array<i64: 1, 1>, scalar_prefetch = 0 : i64, scratch_operands = 1 : i64, tpu.core_type = #tpu.core_type<tc>, window_params = [{transform_indices = @transform_0, window_bounds = array<i64: 16, 128>}, {transform_indices = @transform_1, window_bounds = array<i64: 16, 128>}, {transform_indices = @transform_2, window_bounds = array<i64: 1, 8, 128>}]} {
    %c0_i32 = arith.constant 0 : i32
    %0 = arith.cmpi eq, %arg1, %c0_i32 : i32
    %1 = arith.extui %0 : i1 to i32
    %c0_i32_0 = arith.constant 0 : i32
    %2 = arith.cmpi ne, %1, %c0_i32_0 : i32
    scf.if %2 {
      %cst_10 = arith.constant 0.000000e+00 : f32
      %16 = vector.broadcast %cst_10 : f32 to vector<8x128xf32>
      %c0_11 = arith.constant 0 : index
      %c0_12 = arith.constant 0 : index
      %17 = vector.load %arg5[%c0_11, %c0_12] : memref<8x128xf32, #tpu.memory_space<vmem>>, vector<8x128xf32>
      tpu.vector_store %arg5[%c0_11, %c0_12], %16 {strides = array<i32>} : memref<8x128xf32, #tpu.memory_space<vmem>>, vector<8x128xf32>,
    } else {
    }
    %c0 = arith.constant 0 : index
    %c0_1 = arith.constant 0 : index
    %3 = vector.load %arg2[%c0, %c0_1] : memref<16x128xf32, #tpu.memory_space<vmem>>, vector<16x128xf32>
    %c0_2 = arith.constant 0 : index
    %c0_3 = arith.constant 0 : index
    %4 = vector.load %arg3[%c0_2, %c0_3] : memref<16x128xf32, #tpu.memory_space<vmem>>, vector<16x128xf32>
    %5 = arith.subf %3, %4 : vector<16x128xf32>
    %6 = math.absf %5 : vector<16x128xf32>
    %7 = arith.mulf %6, %6 : vector<16x128xf32>
    %c0_4 = arith.constant 0 : index
    %c0_5 = arith.constant 0 : index
    %8 = vector.load %arg5[%c0_4, %c0_5] : memref<8x128xf32, #tpu.memory_space<vmem>>, vector<8x128xf32>
    %9 = vector.shape_cast %7 : vector<16x128xf32> to vector<2x8x128xf32>
    %cst = arith.constant dense<0.000000e+00> : vector<8x128xf32>
    %10 = vector.multi_reduction <add>, %9, %cst [0] : vector<2x8x128xf32> to vector<8x128xf32>
    %11 = arith.addf %8, %10 : vector<8x128xf32>
    %c0_6 = arith.constant 0 : index
    %c0_7 = arith.constant 0 : index
    %12 = vector.load %arg5[%c0_6, %c0_7] : memref<8x128xf32, #tpu.memory_space<vmem>>, vector<8x128xf32>
    tpu.vector_store %arg5[%c0_6, %c0_7], %11 {strides = array<i32>} : memref<8x128xf32, #tpu.memory_space<vmem>>, vector<8x128xf32>,
    %c0_i32_8 = arith.constant 0 : i32
    %13 = arith.cmpi eq, %arg1, %c0_i32_8 : i32
    %14 = arith.extui %13 : i1 to i32
    %c0_i32_9 = arith.constant 0 : i32
    %15 = arith.cmpi ne, %14, %c0_i32_9 : i32
    scf.if %15 {
      %c0_10 = arith.constant 0 : index
      %c0_11 = arith.constant 0 : index
      %16 = vector.load %arg5[%c0_10, %c0_11] : memref<8x128xf32, #tpu.memory_space<vmem>>, vector<8x128xf32>
      %17 = vector.shape_cast %16 : vector<8x128xf32> to vector<1x8x128xf32>
      %c0_12 = arith.constant 0 : index
      %c0_13 = arith.constant 0 : index
      %c0_14 = arith.constant 0 : index
      %18 = vector.load %arg4[%c0_12, %c0_13, %c0_14] : memref<1x8x128xf32, #tpu.memory_space<vmem>>, vector<1x8x128xf32>
      tpu.vector_store %arg4[%c0_12, %c0_13, %c0_14], %17 {strides = array<i32>} : memref<1x8x128xf32, #tpu.memory_space<vmem>>, vector<1x8x128xf32>,
    } else {
    }
    return
  }
  func.func @transform_0(%arg0: i32, %arg1: i32) -> (i32, i32) {
    %c1_i32 = arith.constant 1 : i32
    %0 = arith.muli %arg0, %c1_i32 : i32
    %1 = arith.addi %0, %arg1 : i32
    %c0_i32 = arith.constant 0 : i32
    %2 = arith.minsi %1, %c0_i32 : i32
    %c0_i32_0 = arith.constant 0 : i32
    %c0_i32_1 = arith.constant 0 : i32
    return %2, %c0_i32_0 : i32, i32
  }
  func.func @transform_1(%arg0: i32, %arg1: i32) -> (i32, i32) {
    %c1_i32 = arith.constant 1 : i32
    %0 = arith.muli %arg0, %c1_i32 : i32
    %1 = arith.addi %0, %arg1 : i32
    %c0_i32 = arith.constant 0 : i32
    %2 = arith.minsi %1, %c0_i32 : i32
    %c0_i32_0 = arith.constant 0 : i32
    %c0_i32_1 = arith.constant 0 : i32
    return %2, %c0_i32_0 : i32, i32
  }
  func.func @transform_2(%arg0: i32, %arg1: i32) -> (i32, i32, i32) {
    %c0_i32 = arith.constant 0 : i32
    %c0_i32_0 = arith.constant 0 : i32
    %c0_i32_1 = arith.constant 0 : i32
    return %arg0, %c0_i32, %c0_i32_0 : i32, i32, i32
  }
}

</mosaic_0001>

<bundles_post_ra>
// kernel: tpu_custom_call.1
= control target key start
LH: loop header
LB: loop body
LE: loop exit
PB: predicated region body
PF: predicated region fallthrough
CT: control target
= control target key end

     0   :  { %7 = vsyncpa [#allocation4], 0  ;;  %s222_s0 = inlined_call_operand.hbm [shape: f32[16,128], index: 0, kind: input, shape index: {}]   ;;  %s223_s1 = inlined_call_operand.hbm [shape: f32[16,128], index: 1, kind: input, shape index: {}]   ;;  %s224_s2 = inlined_call_operand.hbm [shape: f32[1,8,128], index: 2, kind: output, shape index: {}]  }
   0x1   :  { %8 = vsyncpa [#allocation7], 0 }
   0x2   :  { %9 = vsyncpa [#allocation5], 0  ;;  %s20_s11 = sshll.u32 %s222_s0, 4  ;;  %s193_s12 = smov [#allocation3]   ;;  %s21_s11 = int_to_ptr.hbm [resolvable:$true] %s20_s11 }
   0x3   :  { %s22_s13 = sshll.u32 %s193_s12, 4  ;;  %s39_s16 = sshll.u32 %s223_s1, 4  ;;  %s23_s13 = int_to_ptr.vmem [resolvable:$true] %s22_s13  ;;  %s40_s16 = int_to_ptr.hbm [resolvable:$true] %s39_s16 }
   0x4   :  { %s194_s17 = smov 128   ;;  %s195_s18 = smov 8  }
   0x5   :  { %28 = dma.hbm_to_vmem [thread:$0]  %s21_s11, 256, %s23_s13, [#allocation4], %s194_s17, %s194_s17, %s195_s18  }
   0x6   :  { %s196_s19 = smov [#allocation6]  }
   0x7   :  { %s41_s20 = sshll.u32 %s196_s19, 4  ;;  %s42_s20 = int_to_ptr.vmem [resolvable:$true] %s41_s20 }
   0x8   :  { %47 = dma.hbm_to_vmem [thread:$0]  %s40_s16, 256, %s42_s20, [#allocation7], %s194_s17, %s194_s17, %s195_s18  }
   0x9   :  { %187 = dma.done.wait [#allocation4], 256  }
   0xa   :  { %188 = vsyncadd [#allocation4], 4294967040 }
   0xb   :  { %189 = dma.done.wait [#allocation7], 256  }
   0xc   :  { %190 = vsyncadd [#allocation7], 4294967040  ;;  %v69_v0 = vld [vmem:[#allocation3] sm:$0xff]  ;;  %v70_v1 = vld [vmem:[#allocation3 + $0x8] sm:$0xff]  ;;  %s197_s0 = smov [#allocation8]   ;;  %s95_s23 = sshll.u32 %s224_s2, 4  ;;  %s96_s23 = int_to_ptr.hbm [resolvable:$true] %s95_s23 }
   0xd   :  { %v71_v2 = vld [vmem:[#allocation6] sm:$0xff]  ;;  %v72_v3 = vld [vmem:[#allocation6 + $0x8] sm:$0xff]  ;;  %s93_s1 = sshll.u32 %s197_s0, 4  ;;  %s94_s1 = int_to_ptr.vmem [resolvable:$true] %s93_s1 }
   0xe   :  { %v73_v4 = vsub.f32 %v69_v0, %v71_v2  ;;  %v74_v5 = vsub.f32 %v70_v1, %v72_v3 }
  0x10   :  { %v75_v6 = vand.u32 2147483647, %v73_v4  ;;  %v76_v7 = vand.u32 2147483647, %v74_v5 }
  0x12   :  { %v77_v8 = vmul.f32 %v75_v6, %v75_v6  ;;  %v78_v9 = vmul.f32 %v76_v7, %v76_v7 }
  0x14   :  { %v80_v10 = vadd.f32 %v78_v9, %v77_v8 }
  0x16   :  { %87 = vst [vmem:[#allocation8] sm:$0xff] %v80_v10 }
  0x17   :  { %98 = dma.vmem_to_hbm [thread:$0]  %s94_s1, 128, %s96_s23, [#allocation5]  }
  0x18   :  { %191 = dma.done.wait [#allocation5], 128  }
  0x19   :  { %192 = vsyncadd [#allocation5], 4294967168 }
  0x1a   :  { %103 = vsyncpa [#allocation4], 1 }
  0x1b   :  { %104 = vsyncpa [#allocation7], 1 }
  0x1c   :  { %105 = vsyncpa [#allocation5], 1 }

</bundles_post_ra>
